<compile_context>
chip_gen: v7x
topology: tpu7x:2x2x1
jax: 0.10.0
libtpu: 0.0.40
codegen_flags: <defaults>
</compile_context>

<pallas_src>
import math
import jax
import jax.numpy as jnp
from jax.experimental import pallas as pl
from jax.experimental.pallas import tpu as pltpu

# ----------------------------- model config ---------------------------------
B = 2          # batch
L = 8          # sequence length (variates in iTransformer)
D_MODEL = 32
N_HEADS = 4
D_HEAD = D_MODEL // N_HEADS
D_FF = 4 * D_MODEL
LN_EPS = 1e-5
MXU_DTYPE = jnp.bfloat16   # weight-matmul operand dtype (accumulation is float32)


def encoder_layer_kernel(x_ref, wqkv_ref, wo_ref, w1_ref, w2_ref, vec_ref, o_ref):
    """Full encoder layer, whole batch in one invocation (everything in VMEM).

    x_ref    : (B, L, D)      f32
    wqkv_ref : (D, 3D)        bf16   concatenated [wq | wk | wv]
    wo_ref   : (D, D)         bf16
    w1_ref   : (D, D_FF)      bf16
    w2_ref   : (D_FF, D)      bf16
    vec_ref  : (8, D_FF)      f32    rows: bqkv, bo, b1, b2, g1, be1, g2, be2
                                     (zero padded to D_FF width)
    """
    bsz, seq, d = x_ref.shape
    rows = bsz * seq
    nheads = N_HEADS
    dh = d // nheads
    dff = w1_ref.shape[1]
    f32 = jnp.float32

    x2 = x_ref[...].reshape(rows, d)                         # (B*L, D) f32

    # ---- fused q/k/v projection: ONE lane-dense matmul ----------------------
    qkv = jnp.dot(x2.astype(MXU_DTYPE), wqkv_ref[...],
                  preferred_element_type=f32)                # (B*L, 3D)
    qkv = qkv + vec_ref[0:1, 0:3 * d]                        # + [bq|bk|bv]

    # split heads via static lane slices; attention core stays f32
    def head_stack(base):
        return jnp.stack([qkv[:, base + h * dh: base + (h + 1) * dh]
                          for h in range(nheads)], axis=0)   # (H, B*L, Dh)

    qh = head_stack(0)
    kh = head_stack(d)
    vh = head_stack(2 * d)

    # ---- attention: batch folded into the row axis, cross-batch masked ------
    scale = 1.0 / math.sqrt(dh)
    s = jnp.einsum('hlf,hmf->hlm', qh, kh,
                   preferred_element_type=f32) * scale       # (H, B*L, B*L)

    # additive block-diagonal mask: row l attends only within its own batch elem
    rid = jax.lax.broadcasted_iota(jnp.int32, (rows, rows), 0)
    cid = jax.lax.broadcasted_iota(jnp.int32, (rows, rows), 1)
    same = jnp.zeros((rows, rows), dtype=jnp.bool_)
    for b in range(bsz):                                     # static, tiny loop
        in_r = (rid >= b * seq) & (rid < (b + 1) * seq)
        in_c = (cid >= b * seq) & (cid < (b + 1) * seq)
        same = same | (in_r & in_c)
    s = s + jnp.where(same, 0.0, -1e30)[None]

    # softmax (approx reciprocal on EUP -> rows sum to ~1, fine for inference)
    s = s - jnp.max(s, axis=-1, keepdims=True)
    p = jnp.exp(s)
    p = p * pl.reciprocal(jnp.sum(p, axis=-1, keepdims=True), approx=True)
    attn = jnp.einsum('hlm,hmf->hlf', p, vh,
                      preferred_element_type=f32)            # (H, B*L, Dh)

    attn2 = jnp.concatenate([attn[h] for h in range(nheads)], axis=-1)  # (B*L, D)

    # ---- output projection: ONE matmul --------------------------------------
    new_x = jnp.dot(attn2.astype(MXU_DTYPE), wo_ref[...],
                    preferred_element_type=f32) + vec_ref[1:2, 0:d]     # + bo

    # ---- residual + LayerNorm 1 ----------------------------------------------
    x1 = x2 + new_x
    mu1 = jnp.mean(x1, axis=-1, keepdims=True)
    var1 = jnp.mean((x1 - mu1) ** 2, axis=-1, keepdims=True)
    xn = (x1 - mu1) * jax.lax.rsqrt(var1 + LN_EPS)
    xn = xn * vec_ref[4:5, 0:d] + vec_ref[5:6, 0:d]          # gamma1, beta1

    # ---- position-wise FFN (Conv1d k=1 == matmul), ReLU ----------------------
    y = jnp.dot(xn.astype(MXU_DTYPE), w1_ref[...],
                preferred_element_type=f32) + vec_ref[2:3, 0:dff]       # + b1
    y = jnp.maximum(y, 0.0)
    y = jnp.dot(y.astype(MXU_DTYPE), w2_ref[...],
                preferred_element_type=f32) + vec_ref[3:4, 0:d]         # + b2

    # ---- residual + LayerNorm 2 ----------------------------------------------
    z = xn + y
    mu2 = jnp.mean(z, axis=-1, keepdims=True)
    var2 = jnp.mean((z - mu2) ** 2, axis=-1, keepdims=True)
    out = (z - mu2) * jax.lax.rsqrt(var2 + LN_EPS)
    out = out * vec_ref[6:7, 0:d] + vec_ref[7:8, 0:d]        # gamma2, beta2

    o_ref[...] = out.reshape(bsz, seq, d).astype(o_ref.dtype)


@jax.jit
def encoder_layer(x, params):
    """x: (B, L, D) float32.  Returns (B, L, D) float32."""
    (wq, wk, wv, wo, bq, bk, bv, bo,
     w1, b1, w2, b2, g1, be1, g2, be2) = params
    Bn, Ln, Dn = x.shape
    Dff = w1.shape[1]
    width = max(Dff, 3 * Dn)

    # --- host-side (free XLA) packing: no batch/head replication anywhere ----
    wqkv = jnp.concatenate([wq, wk, wv], axis=1).astype(MXU_DTYPE)   # (D, 3D)
    bqkv = jnp.concatenate([bq, bk, bv], axis=0)                     # (3D,)

    def pad_row(v):               # (k,) -> (1, width) zero padded
        v = v.reshape(1, -1)
        return jnp.pad(v, ((0, 0), (0, width - v.shape[-1])))

    # row order must match the kernel's hard-coded indices:
    #   0: bqkv  1: bo  2: b1  3: b2  4: g1  5: be1  6: g2  7: be2
    vec = jnp.concatenate([pad_row(bqkv), pad_row(bo), pad_row(b1), pad_row(b2),
                           pad_row(g1), pad_row(be1), pad_row(g2), pad_row(be2)],
                          axis=0).astype(jnp.float32)                # (8, width)

    vmem = pl.BlockSpec(memory_space=pltpu.MemorySpace.VMEM)
    return pl.pallas_call(
        encoder_layer_kernel,
        out_shape=jax.ShapeDtypeStruct((Bn, Ln, Dn), jnp.float32),
        in_specs=[vmem] * 6,
        out_specs=vmem,
    )(x, wqkv, wo.astype(MXU_DTYPE), w1.astype(MXU_DTYPE),
      w2.astype(MXU_DTYPE), vec)


# ------------------------- reference (pure JAX, f32) --------------------------
def encoder_layer_ref(x, params):
    (wq, wk, wv, wo, bq, bk, bv, bo,
     w1, b1, w2, b2, g1, be1, g2, be2) = params
    Bn, Ln, Dn = x.shape
    H, Dh = N_HEADS, Dn // N_HEADS

    def ln(z, g, b):
        mu = z.mean(-1, keepdims=True)
        var = ((z - mu) ** 2).mean(-1, keepdims=True)
        return (z - mu) / jnp.sqrt(var + LN_EPS) * g + b

    q = (x @ wq + bq).reshape(Bn, Ln, H, Dh)
    k = (x @ wk + bk).reshape(Bn, Ln, H, Dh)
    v = (x @ wv + bv).reshape(Bn, Ln, H, Dh)
    s = jnp.einsum('blhd,bmhd->bhlm', q, k) / math.sqrt(Dh)
    p = jax.nn.softmax(s, axis=-1)
    a = jnp.einsum('bhlm,bmhd->blhd', p, v).reshape(Bn, Ln, Dn)
    new_x = a @ wo + bo

    x1 = ln(x + new_x, g1, be1)
    y = jnp.maximum(x1 @ w1 + b1, 0.0) @ w2 + b2
    return ln(x1 + y, g2, be2)


# ------------------------------- main ----------------------------------------
if __name__ == "__main__":
    key = jax.random.PRNGKey(0)
    ks = jax.random.split(key, 16)

    def init(k, shape, fan_in):
        bound = 1.0 / math.sqrt(fan_in)
        return jax.random.uniform(k, shape, jnp.float32, -bound, bound)

    # attention projections (stored as (in, out) so x @ W applies them)
    wq = init(ks[0], (D_MODEL, D_MODEL), D_MODEL)
    wk = init(ks[1], (D_MODEL, D_MODEL), D_MODEL)
    wv = init(ks[2], (D_MODEL, D_MODEL), D_MODEL)
    wo = init(ks[3], (D_MODEL, D_MODEL), D_MODEL)
    bq = init(ks[4], (D_MODEL,), D_MODEL)
    bk = init(ks[5], (D_MODEL,), D_MODEL)
    bv = init(ks[6], (D_MODEL,), D_MODEL)
    bo = init(ks[7], (D_MODEL,), D_MODEL)
    # conv1 (d_ff, d_model, 1) -> matmul weight (d_model, d_ff); conv2 likewise
    w1 = init(ks[8], (D_MODEL, D_FF), D_MODEL)
    b1 = init(ks[9], (D_FF,), D_MODEL)
    w2 = init(ks[10], (D_FF, D_MODEL), D_FF)
    b2 = init(ks[11], (D_MODEL,), D_FF)
    # layernorm affine params
    g1 = jnp.ones((D_MODEL,), jnp.float32)
    be1 = jnp.zeros((D_MODEL,), jnp.float32)
    g2 = jnp.ones((D_MODEL,), jnp.float32)
    be2 = jnp.zeros((D_MODEL,), jnp.float32)

    params = (wq, wk, wv, wo, bq, bk, bv, bo,
              w1, b1, w2, b2, g1, be1, g2, be2)

    x = jax.random.normal(ks[12], (B, L, D_MODEL), jnp.float32)

    out = jax.block_until_ready(encoder_layer(x, params))
    ref = encoder_layer_ref(x, params)

    assert out.shape == (B, L, D_MODEL)
    # bf16 weight matmuls (f32 accumulation, f32 attention core) + approx softmax
    # reciprocal vs. exact f32 reference.
    tol = 3e-2 if MXU_DTYPE == jnp.bfloat16 else 1e-4
    err = float(jnp.max(jnp.abs(out - ref)))
    assert jnp.allclose(out, ref, atol=tol, rtol=tol), f"max err {err}"
    # TODO(synk): dropout is identity (eval mode); training-mode RNG dropout not implemented.
    print("KERNEL_OK")
</pallas_src>

<mosaic_0001>
module attributes {stable_mosaic.version = 11 : i64} {
  func.func @encoder_layer_kernel(%arg0: memref<2x8x32xf32, #tpu.memory_space<vmem>>, %arg1: memref<32x96xbf16, #tpu.memory_space<vmem>>, %arg2: memref<32x32xbf16, #tpu.memory_space<vmem>>, %arg3: memref<32x128xbf16, #tpu.memory_space<vmem>>, %arg4: memref<128x32xbf16, #tpu.memory_space<vmem>>, %arg5: memref<8x128xf32, #tpu.memory_space<vmem>>, %arg6: memref<2x8x32xf32, #tpu.memory_space<vmem>>) attributes {dimension_semantics = [], scalar_prefetch = 0 : i64, scratch_operands = 0 : i64, tpu.core_type = #tpu.core_type<tc>} {
    %c0 = arith.constant 0 : index
    %c0_0 = arith.constant 0 : index
    %c0_1 = arith.constant 0 : index
    %0 = vector.load %arg0[%c0, %c0_0, %c0_1] : memref<2x8x32xf32, #tpu.memory_space<vmem>>, vector<2x8x32xf32>
    %1 = vector.shape_cast %0 : vector<2x8x32xf32> to vector<16x32xf32>
    %2 = arith.truncf %1 : vector<16x32xf32> to vector<16x32xbf16>
    %c0_2 = arith.constant 0 : index
    %c0_3 = arith.constant 0 : index
    %3 = vector.load %arg1[%c0_2, %c0_3] : memref<32x96xbf16, #tpu.memory_space<vmem>>, vector<32x96xbf16>
    %cst = arith.constant dense<0.000000e+00> : vector<16x96xf32>
    %4 = tpu.matmul %2, %3, %cst {dimension_numbers = #tpu.dot_dimension_numbers<[1], [0], [0], [1], [0, 0, 1, 1], [], []>} : vector<16x32xbf16>, vector<32x96xbf16>, vector<16x96xf32> -> vector<16x96xf32>
    %c0_4 = arith.constant 0 : index
    %c0_5 = arith.constant 0 : index
    %5 = vector.load %arg5[%c0_4, %c0_5] : memref<8x128xf32, #tpu.memory_space<vmem>>, vector<1x96xf32>
    %6 = vector.broadcast %5 : vector<1x96xf32> to vector<16x96xf32>
    %7 = arith.addf %4, %6 : vector<16x96xf32>
    %8 = vector.extract_strided_slice %7 {offsets = [0, 0], sizes = [16, 8], strides = [1, 1]} : vector<16x96xf32> to vector<16x8xf32>
    %9 = vector.extract_strided_slice %7 {offsets = [0, 8], sizes = [16, 8], strides = [1, 1]} : vector<16x96xf32> to vector<16x8xf32>
    %10 = vector.extract_strided_slice %7 {offsets = [0, 16], sizes = [16, 8], strides = [1, 1]} : vector<16x96xf32> to vector<16x8xf32>
    %11 = vector.extract_strided_slice %7 {offsets = [0, 24], sizes = [16, 8], strides = [1, 1]} : vector<16x96xf32> to vector<16x8xf32>
    %12 = vector.shape_cast %8 : vector<16x8xf32> to vector<1x16x8xf32>
    %13 = vector.shape_cast %9 : vector<16x8xf32> to vector<1x16x8xf32>
    %14 = vector.shape_cast %10 : vector<16x8xf32> to vector<1x16x8xf32>
    %15 = vector.shape_cast %11 : vector<16x8xf32> to vector<1x16x8xf32>
    %16 = tpu.concatenate %12, %13, %14, %15 in 0 : vector<1x16x8xf32>, vector<1x16x8xf32>, vector<1x16x8xf32>, vector<1x16x8xf32> -> vector<4x16x8xf32>
    %17 = vector.extract_strided_slice %7 {offsets = [0, 32], sizes = [16, 8], strides = [1, 1]} : vector<16x96xf32> to vector<16x8xf32>
    %18 = vector.extract_strided_slice %7 {offsets = [0, 40], sizes = [16, 8], strides = [1, 1]} : vector<16x96xf32> to vector<16x8xf32>
    %19 = vector.extract_strided_slice %7 {offsets = [0, 48], sizes = [16, 8], strides = [1, 1]} : vector<16x96xf32> to vector<16x8xf32>
    %20 = vector.extract_strided_slice %7 {offsets = [0, 56], sizes = [16, 8], strides = [1, 1]} : vector<16x96xf32> to vector<16x8xf32>
    %21 = vector.shape_cast %17 : vector<16x8xf32> to vector<1x16x8xf32>
    %22 = vector.shape_cast %18 : vector<16x8xf32> to vector<1x16x8xf32>
    %23 = vector.shape_cast %19 : vector<16x8xf32> to vector<1x16x8xf32>
    %24 = vector.shape_cast %20 : vector<16x8xf32> to vector<1x16x8xf32>
    %25 = tpu.concatenate %21, %22, %23, %24 in 0 : vector<1x16x8xf32>, vector<1x16x8xf32>, vector<1x16x8xf32>, vector<1x16x8xf32> -> vector<4x16x8xf32>
    %26 = vector.extract_strided_slice %7 {offsets = [0, 64], sizes = [16, 8], strides = [1, 1]} : vector<16x96xf32> to vector<16x8xf32>
    %27 = vector.extract_strided_slice %7 {offsets = [0, 72], sizes = [16, 8], strides = [1, 1]} : vector<16x96xf32> to vector<16x8xf32>
    %28 = vector.extract_strided_slice %7 {offsets = [0, 80], sizes = [16, 8], strides = [1, 1]} : vector<16x96xf32> to vector<16x8xf32>
    %29 = vector.extract_strided_slice %7 {offsets = [0, 88], sizes = [16, 8], strides = [1, 1]} : vector<16x96xf32> to vector<16x8xf32>
    %30 = vector.shape_cast %26 : vector<16x8xf32> to vector<1x16x8xf32>
    %31 = vector.shape_cast %27 : vector<16x8xf32> to vector<1x16x8xf32>
    %32 = vector.shape_cast %28 : vector<16x8xf32> to vector<1x16x8xf32>
    %33 = vector.shape_cast %29 : vector<16x8xf32> to vector<1x16x8xf32>
    %34 = tpu.concatenate %30, %31, %32, %33 in 0 : vector<1x16x8xf32>, vector<1x16x8xf32>, vector<1x16x8xf32>, vector<1x16x8xf32> -> vector<4x16x8xf32>
    "tpu.trace_start"() <{level = 10 : i32, message = "hlf,hmf->hlm"}> : () -> ()
    %cst_6 = arith.constant dense<0.000000e+00> : vector<4x16x16xf32>
    %35 = tpu.matmul %16, %25, %cst_6 {dimension_numbers = #tpu.dot_dimension_numbers<[2], [2], [1], [1], [0, 0, 0, 1, 1, 1], [0], [0]>} : vector<4x16x8xf32>, vector<4x16x8xf32>, vector<4x16x16xf32> -> vector<4x16x16xf32>
    "tpu.trace_stop"() : () -> ()
    %cst_7 = arith.constant 0.353553385 : f32
    %36 = vector.broadcast %cst_7 : f32 to vector<4x16x16xf32>
    %37 = arith.mulf %35, %36 : vector<4x16x16xf32>
    %38 = tpu.iota {dimensions = array<i32: 0>} : vector<16x16xi32>
    %39 = tpu.iota {dimensions = array<i32: 1>} : vector<16x16xi32>
    %false = arith.constant false
    %40 = vector.broadcast %false : i1 to vector<16x16xi1>
    %c0_i32 = arith.constant 0 : i32
    %41 = vector.broadcast %c0_i32 : i32 to vector<16x16xi32>
    %42 = arith.cmpi sge, %38, %41 : vector<16x16xi32>
    %c8_i32 = arith.constant 8 : i32
    %43 = vector.broadcast %c8_i32 : i32 to vector<16x16xi32>
    %44 = arith.cmpi slt, %38, %43 : vector<16x16xi32>
    %45 = arith.andi %42, %44 : vector<16x16xi1>
    %c0_i32_8 = arith.constant 0 : i32
    %46 = vector.broadcast %c0_i32_8 : i32 to vector<16x16xi32>
    %47 = arith.cmpi sge, %39, %46 : vector<16x16xi32>
    %c8_i32_9 = arith.constant 8 : i32
    %48 = vector.broadcast %c8_i32_9 : i32 to vector<16x16xi32>
    %49 = arith.cmpi slt, %39, %48 : vector<16x16xi32>
    %50 = arith.andi %47, %49 : vector<16x16xi1>
    %51 = arith.andi %45, %50 : vector<16x16xi1>
    %52 = arith.ori %40, %51 : vector<16x16xi1>
    %c8_i32_10 = arith.constant 8 : i32
    %53 = vector.broadcast %c8_i32_10 : i32 to vector<16x16xi32>
    %54 = arith.cmpi sge, %38, %53 : vector<16x16xi32>
    %c16_i32 = arith.constant 16 : i32
    %55 = vector.broadcast %c16_i32 : i32 to vector<16x16xi32>
    %56 = arith.cmpi slt, %38, %55 : vector<16x16xi32>
    %57 = arith.andi %54, %56 : vector<16x16xi1>
    %c8_i32_11 = arith.constant 8 : i32
    %58 = vector.broadcast %c8_i32_11 : i32 to vector<16x16xi32>
    %59 = arith.cmpi sge, %39, %58 : vector<16x16xi32>
    %c16_i32_12 = arith.constant 16 : i32
    %60 = vector.broadcast %c16_i32_12 : i32 to vector<16x16xi32>
    %61 = arith.cmpi slt, %39, %60 : vector<16x16xi32>
    %62 = arith.andi %59, %61 : vector<16x16xi1>
    %63 = arith.andi %57, %62 : vector<16x16xi1>
    %64 = arith.ori %52, %63 : vector<16x16xi1>
    %cst_13 = arith.constant 0.000000e+00 : f32
    %cst_14 = arith.constant -1.000000e+30 : f32
    %65 = vector.broadcast %cst_13 : f32 to vector<16x16xf32>
    %66 = vector.broadcast %cst_14 : f32 to vector<16x16xf32>
    %67 = arith.select %64, %65, %66 : vector<16x16xi1>, vector<16x16xf32>
    %68 = vector.shape_cast %67 : vector<16x16xf32> to vector<1x16x16xf32>
    %69 = vector.broadcast %68 : vector<1x16x16xf32> to vector<4x16x16xf32>
    %70 = arith.addf %37, %69 : vector<4x16x16xf32>
    %cst_15 = arith.constant dense<0xFF800000> : vector<4x16xf32>
    %71 = vector.multi_reduction <maximumf>, %70, %cst_15 [2] : vector<4x16x16xf32> to vector<4x16xf32>
    %72 = vector.shape_cast %71 : vector<4x16xf32> to vector<4x16x1xf32>
    %73 = vector.broadcast %72 : vector<4x16x1xf32> to vector<4x16x16xf32>
    %74 = arith.subf %70, %73 : vector<4x16x16xf32>
    %75 = math.exp %74 : vector<4x16x16xf32>
    %cst_16 = arith.constant dense<0.000000e+00> : vector<4x16xf32>
    %76 = vector.multi_reduction <add>, %75, %cst_16 [2] : vector<4x16x16xf32> to vector<4x16xf32>
    %77 = vector.shape_cast %76 : vector<4x16xf32> to vector<4x16x1xf32>
    %78 = tpu.reciprocal %77 {approx = true} : vector<4x16x1xf32> -> vector<4x16x1xf32>
    %79 = vector.broadcast %78 : vector<4x16x1xf32> to vector<4x16x16xf32>
    %80 = arith.mulf %75, %79 : vector<4x16x16xf32>
    "tpu.trace_start"() <{level = 10 : i32, message = "hlm,hmf->hlf"}> : () -> ()
    %cst_17 = arith.constant dense<0.000000e+00> : vector<4x16x8xf32>
    %81 = tpu.matmul %80, %34, %cst_17 {dimension_numbers = #tpu.dot_dimension_numbers<[2], [1], [1], [2], [0, 0, 0, 1, 1, 2], [0], [0]>} : vector<4x16x16xf32>, vector<4x16x8xf32>, vector<4x16x8xf32> -> vector<4x16x8xf32>
    "tpu.trace_stop"() : () -> ()
    %82 = vector.extract_strided_slice %81 {offsets = [0, 0, 0], sizes = [1, 16, 8], strides = [1, 1, 1]} : vector<4x16x8xf32> to vector<1x16x8xf32>
    %83 = vector.shape_cast %82 : vector<1x16x8xf32> to vector<16x8xf32>
    %84 = vector.extract_strided_slice %81 {offsets = [1, 0, 0], sizes = [1, 16, 8], strides = [1, 1, 1]} : vector<4x16x8xf32> to vector<1x16x8xf32>
    %85 = vector.shape_cast %84 : vector<1x16x8xf32> to vector<16x8xf32>
    %86 = vector.extract_strided_slice %81 {offsets = [2, 0, 0], sizes = [1, 16, 8], strides = [1, 1, 1]} : vector<4x16x8xf32> to vector<1x16x8xf32>
    %87 = vector.shape_cast %86 : vector<1x16x8xf32> to vector<16x8xf32>
    %88 = vector.extract_strided_slice %81 {offsets = [3, 0, 0], sizes = [1, 16, 8], strides = [1, 1, 1]} : vector<4x16x8xf32> to vector<1x16x8xf32>
    %89 = vector.shape_cast %88 : vector<1x16x8xf32> to vector<16x8xf32>
    %90 = tpu.concatenate %83, %85, %87, %89 in 1 : vector<16x8xf32>, vector<16x8xf32>, vector<16x8xf32>, vector<16x8xf32> -> vector<16x32xf32>
    %91 = arith.truncf %90 : vector<16x32xf32> to vector<16x32xbf16>
    %c0_18 = arith.constant 0 : index
    %c0_19 = arith.constant 0 : index
    %92 = vector.load %arg2[%c0_18, %c0_19] : memref<32x32xbf16, #tpu.memory_space<vmem>>, vector<32x32xbf16>
    %cst_20 = arith.constant dense<0.000000e+00> : vector<16x32xf32>
    %93 = tpu.matmul %91, %92, %cst_20 {dimension_numbers = #tpu.dot_dimension_numbers<[1], [0], [0], [1], [0, 0, 1, 1], [], []>} : vector<16x32xbf16>, vector<32x32xbf16>, vector<16x32xf32> -> vector<16x32xf32>
    %c1 = arith.constant 1 : index
    %c0_21 = arith.constant 0 : index
    %94 = vector.load %arg5[%c1, %c0_21] : memref<8x128xf32, #tpu.memory_space<vmem>>, vector<1x32xf32>
    %95 = vector.broadcast %94 : vector<1x32xf32> to vector<16x32xf32>
    %96 = arith.addf %93, %95 : vector<16x32xf32>
    %97 = arith.addf %1, %96 : vector<16x32xf32>
    %cst_22 = arith.constant dense<0.000000e+00> : vector<16xf32>
    %98 = vector.multi_reduction <add>, %97, %cst_22 [1] : vector<16x32xf32> to vector<16xf32>
    %99 = vector.shape_cast %98 : vector<16xf32> to vector<16x1xf32>
    %cst_23 = arith.constant 3.200000e+01 : f32
    %100 = vector.broadcast %cst_23 : f32 to vector<16x1xf32>
    %101 = arith.divf %99, %100 : vector<16x1xf32>
    %102 = vector.broadcast %101 : vector<16x1xf32> to vector<16x32xf32>
    %103 = arith.subf %97, %102 : vector<16x32xf32>
    %104 = arith.mulf %103, %103 : vector<16x32xf32>
    %cst_24 = arith.constant dense<0.000000e+00> : vector<16xf32>
    %105 = vector.multi_reduction <add>, %104, %cst_24 [1] : vector<16x32xf32> to vector<16xf32>
    %106 = vector.shape_cast %105 : vector<16xf32> to vector<16x1xf32>
    %cst_25 = arith.constant 3.200000e+01 : f32
    %107 = vector.broadcast %cst_25 : f32 to vector<16x1xf32>
    %108 = arith.divf %106, %107 : vector<16x1xf32>
    %109 = vector.broadcast %101 : vector<16x1xf32> to vector<16x32xf32>
    %110 = arith.subf %97, %109 : vector<16x32xf32>
    %cst_26 = arith.constant 9.99999974E-6 : f32
    %111 = vector.broadcast %cst_26 : f32 to vector<16x1xf32>
    %112 = arith.addf %108, %111 : vector<16x1xf32>
    %113 = math.rsqrt %112 : vector<16x1xf32>
    %114 = vector.broadcast %113 : vector<16x1xf32> to vector<16x32xf32>
    %115 = arith.mulf %110, %114 : vector<16x32xf32>
    %c4 = arith.constant 4 : index
    %c0_27 = arith.constant 0 : index
    %116 = vector.load %arg5[%c4, %c0_27] : memref<8x128xf32, #tpu.memory_space<vmem>>, vector<1x32xf32>
    %117 = vector.broadcast %116 : vector<1x32xf32> to vector<16x32xf32>
    %118 = arith.mulf %115, %117 : vector<16x32xf32>
    %c5 = arith.constant 5 : index
    %c0_28 = arith.constant 0 : index
    %119 = vector.load %arg5[%c5, %c0_28] : memref<8x128xf32, #tpu.memory_space<vmem>>, vector<1x32xf32>
    %120 = vector.broadcast %119 : vector<1x32xf32> to vector<16x32xf32>
    %121 = arith.addf %118, %120 : vector<16x32xf32>
    %122 = arith.truncf %121 : vector<16x32xf32> to vector<16x32xbf16>
    %c0_29 = arith.constant 0 : index
    %c0_30 = arith.constant 0 : index
    %123 = vector.load %arg3[%c0_29, %c0_30] : memref<32x128xbf16, #tpu.memory_space<vmem>>, vector<32x128xbf16>
    %cst_31 = arith.constant dense<0.000000e+00> : vector<16x128xf32>
    %124 = tpu.matmul %122, %123, %cst_31 {dimension_numbers = #tpu.dot_dimension_numbers<[1], [0], [0], [1], [0, 0, 1, 1], [], []>} : vector<16x32xbf16>, vector<32x128xbf16>, vector<16x128xf32> -> vector<16x128xf32>
    %c2 = arith.constant 2 : index
    %c0_32 = arith.constant 0 : index
    %125 = vector.load %arg5[%c2, %c0_32] : memref<8x128xf32, #tpu.memory_space<vmem>>, vector<1x128xf32>
    %126 = vector.broadcast %125 : vector<1x128xf32> to vector<16x128xf32>
    %127 = arith.addf %124, %126 : vector<16x128xf32>
    %cst_33 = arith.constant 0.000000e+00 : f32
    %128 = vector.broadcast %cst_33 : f32 to vector<16x128xf32>
    %129 = arith.maximumf %127, %128 : vector<16x128xf32>
    %130 = arith.truncf %129 : vector<16x128xf32> to vector<16x128xbf16>
    %c0_34 = arith.constant 0 : index
    %c0_35 = arith.constant 0 : index
    %131 = vector.load %arg4[%c0_34, %c0_35] : memref<128x32xbf16, #tpu.memory_space<vmem>>, vector<128x32xbf16>
    %cst_36 = arith.constant dense<0.000000e+00> : vector<16x32xf32>
    %132 = tpu.matmul %130, %131, %cst_36 {dimension_numbers = #tpu.dot_dimension_numbers<[1], [0], [0], [1], [0, 0, 1, 1], [], []>} : vector<16x128xbf16>, vector<128x32xbf16>, vector<16x32xf32> -> vector<16x32xf32>
    %c3 = arith.constant 3 : index
    %c0_37 = arith.constant 0 : index
    %133 = vector.load %arg5[%c3, %c0_37] : memref<8x128xf32, #tpu.memory_space<vmem>>, vector<1x32xf32>
    %134 = vector.broadcast %133 : vector<1x32xf32> to vector<16x32xf32>
    %135 = arith.addf %132, %134 : vector<16x32xf32>
    %136 = arith.addf %121, %135 : vector<16x32xf32>
    %cst_38 = arith.constant dense<0.000000e+00> : vector<16xf32>
    %137 = vector.multi_reduction <add>, %136, %cst_38 [1] : vector<16x32xf32> to vector<16xf32>
    %138 = vector.shape_cast %137 : vector<16xf32> to vector<16x1xf32>
    %cst_39 = arith.constant 3.200000e+01 : f32
    %139 = vector.broadcast %cst_39 : f32 to vector<16x1xf32>
    %140 = arith.divf %138, %139 : vector<16x1xf32>
    %141 = vector.broadcast %140 : vector<16x1xf32> to vector<16x32xf32>
    %142 = arith.subf %136, %141 : vector<16x32xf32>
    %143 = arith.mulf %142, %142 : vector<16x32xf32>
    %cst_40 = arith.constant dense<0.000000e+00> : vector<16xf32>
    %144 = vector.multi_reduction <add>, %143, %cst_40 [1] : vector<16x32xf32> to vector<16xf32>
    %145 = vector.shape_cast %144 : vector<16xf32> to vector<16x1xf32>
    %cst_41 = arith.constant 3.200000e+01 : f32
    %146 = vector.broadcast %cst_41 : f32 to vector<16x1xf32>
    %147 = arith.divf %145, %146 : vector<16x1xf32>
    %148 = vector.broadcast %140 : vector<16x1xf32> to vector<16x32xf32>
    %149 = arith.subf %136, %148 : vector<16x32xf32>
    %cst_42 = arith.constant 9.99999974E-6 : f32
    %150 = vector.broadcast %cst_42 : f32 to vector<16x1xf32>
    %151 = arith.addf %147, %150 : vector<16x1xf32>
    %152 = math.rsqrt %151 : vector<16x1xf32>
    %153 = vector.broadcast %152 : vector<16x1xf32> to vector<16x32xf32>
    %154 = arith.mulf %149, %153 : vector<16x32xf32>
    %c6 = arith.constant 6 : index
    %c0_43 = arith.constant 0 : index
    %155 = vector.load %arg5[%c6, %c0_43] : memref<8x128xf32, #tpu.memory_space<vmem>>, vector<1x32xf32>
    %156 = vector.broadcast %155 : vector<1x32xf32> to vector<16x32xf32>
    %157 = arith.mulf %154, %156 : vector<16x32xf32>
    %c7 = arith.constant 7 : index
    %c0_44 = arith.constant 0 : index
    %158 = vector.load %arg5[%c7, %c0_44] : memref<8x128xf32, #tpu.memory_space<vmem>>, vector<1x32xf32>
    %159 = vector.broadcast %158 : vector<1x32xf32> to vector<16x32xf32>
    %160 = arith.addf %157, %159 : vector<16x32xf32>
    %161 = vector.shape_cast %160 : vector<16x32xf32> to vector<2x8x32xf32>
    %c0_45 = arith.constant 0 : index
    %c0_46 = arith.constant 0 : index
    %c0_47 = arith.constant 0 : index
    %162 = vector.load %arg6[%c0_45, %c0_46, %c0_47] : memref<2x8x32xf32, #tpu.memory_space<vmem>>, vector<2x8x32xf32>
    tpu.vector_store %arg6[%c0_45, %c0_46, %c0_47], %161 {strides = array<i32>} : memref<2x8x32xf32, #tpu.memory_space<vmem>>, vector<2x8x32xf32>,
    return
  }
}

</mosaic_0001>

<bundles_post_ra>
// kernel: encoder_layer.1
= control target key start
LH: loop header
LB: loop body
LE: loop exit
PB: predicated region body
PF: predicated region fallthrough
CT: control target
= control target key end

     0   :  { %v1705_v1 = vmov 0.0   ;;  %vm1706_vm0 = vmmov 0   ;;  %vm49_vm1 = vcmask 261120   ;;  %s1976_s0 = inlined_call_operand.vmem [shape: f32[2,8,32], index: 0, kind: input, shape index: {}]   ;;  %s1977_s1 = inlined_call_operand.vmem [shape: bf16[32,96], index: 1, kind: input, shape index: {}]   ;;  %s1978_s2 = inlined_call_operand.vmem [shape: bf16[32,32], index: 2, kind: input, shape index: {}]   ;;  %s1979_s3 = inlined_call_operand.vmem [shape: bf16[32,128], index: 3, kind: input, shape index: {}]   ;;  %s1980_s4 = inlined_call_operand.vmem [shape: bf16[128,32], index: 4, kind: input, shape index: {}]   ;;  %s1981_s5 = inlined_call_operand.vmem [shape: f32[8,128], index: 5, kind: input, shape index: {}]   ;;  %s1982_s6 = inlined_call_operand.hbm [shape: f32[2,8,32], index: 6, kind: output, shape index: {}]  }
   0x1   :  { %v1627_v0 = vld [vmem:[%s1977_s1] sm:$0xff]   ;;  %1419 = vmatprep.subr.bf16.mxu1 %v1705_v1  ;;  %v1628_v2 = vld [vmem:[%s1977_s1 + $0x8] sm:$0xff]   ;;  %1423 = vmatprep.mubr.msk.bf16.mxu1 %vm1706_vm0, %v1705_v1 }
   0x2   :  { %1420 = vmatpush3.bf16.msra.mxu1 %v1627_v0  ;;  %v1765_v3 = vld [vmem:[%s1976_s0] sm:$0xff]  ;;  %v1770_v4 = vld [vmem:[%s1976_s0 + $0x8] sm:$0xff] }
   0x3   :  { %1421 = vmatprep.subr.bf16.mxu1 %v1705_v1  ;;  %v27_v5 = vpack.c.bf16 %v1770_v4, %v1765_v3 }
   0x6   :  { %1422 = vmatpush3.bf16.msra.mxu1 %v1628_v2 }
   0x9   :  { %1424 = vmatmul.mubr.msk.bf16.vlgmr.msra.gmra.mrb[0].mxu1 %vm49_vm1, %v27_v5 }
   0xa   :  { %11 = vsyncpa [#allocation3], 0  ;;  %v1320_v6 = vld [vmem:[%s1981_s5] ss:$0 sm:$0xff]  ;;  %vm112_vm2 = vcmask 64512   ;;  %s1707_s0 = smov 112   ;;  %v468_v40 = vlaneseq }
   0xb   :  { %s1708_s30 = smov 120   ;;  %s1709_s7 = smov 104   ;;  %vm1795_vm3 = vmpackc.low %vm112_vm2, %vm112_vm2  ;;  %v1711_v43 = vmov -1e+30   ;;  %vm504_vm8 = vcmask 130048   ;;  %vm969_vm9 = vcmask 195584  }
   0xc   :  { %s1710_s8 = smov 96   ;;  %v469_v41 = vand.u32 127, %v468_v40  ;;  %s1712_s9 = smov 64  }
   0xd   :  { %s1713_s10 = smov 8   ;;  %s1714_s15 = smov 24  }
   0xe   :  { %vm487_vm4 = vcmp.ge.s32.totalorder %v469_v41, 8  ;;  %vm488_vm5 = vcmp.lt.s32.totalorder %v469_v41, 16  ;;  %vm477_vm7 = vcmp.lt.s32.totalorder %v469_v41, 8  ;;  %s1715_s16 = smov 16   ;;  %s1716_s22 = smov [#allocation2]  }
   0xf   :  { %vm489_vm6 = vmand %vm487_vm4, %vm488_vm5  ;;  %v494_v47 = vsel %vm477_vm7, 0.0, %v1711_v43  ;;  %s1309_s23 = sshll.u32 %s1716_s22, 4  ;;  %s1310_s23 = int_to_ptr.vmem [resolvable:$true] %s1309_s23 }
  0x10   :  { %v495_v44 = vsel %vm489_vm6, 0.0, %v1711_v43  ;;  %s1681_s24 = scalar_lea.vmem %s1310_s23, 256  ;;  %p1686_p1 = scmp.lt.s32.totalorder %s1310_s23, %s1310_s23 }
  0x11   :  { %p1682_p0 = scmp.ne.s32.totalorder %s1310_s23, %s1681_s24  ;;  %p1687_p2 = scmp.lt.s32.totalorder %s1681_s24, %s1681_s24 }
  0x13   :  { %p1688_p3 = por %p1687_p2, %p1686_p1 }
  0x15   :  { %p1689_p4 = pnand %p1688_p3, %p1682_p0 }
  0xdc   :  { %v87_v7 = vpop.f32.mrb[0].mxu1 }
  0xdd   :  { %v88_v8 = vadd.f32 %v1320_v6, %v87_v7  ;;  %v1425_v9 = vpop.f32.mrb[1].mxu1 }
  0xde   :  { %v90_v10 = vpop.f32.mrb[2].mxu1 }
  0xdf   :  { %100 = vrot.lane.b32.xlu1 %v88_v8, %s1707_s0  ;;  %96 = vrot.lane.b32.xlu0 %v88_v8, %s1708_s30  ;;  %v1426_v11 = vpop.f32.mrb[3].mxu1  ;;  %v91_v12 = vadd.f32 %v1320_v6, %v90_v10 }
  0xe0   :  { %1431 = vmatprep.mubr.msk.f32.mxu1 %vm112_vm2, %v88_v8 }
  0xe1   :  { %v1780_v13 = vpack.i.bf16 %v91_v12, %v88_v8 }
  0xe3   :  { %102 = vrot.lane.b32.xlu1 %v91_v12, %s1707_s0  ;;  %98 = vrot.lane.b32.xlu0 %v91_v12, %s1708_s30 }
  0xe7   :  { %106 = vrot.lane.b32.xlu1 %v91_v12, %s1709_s7  ;;  %104 = vrot.lane.b32.xlu0 %v88_v8, %s1709_s7 }
  0xeb   :  { %1573 = vrot.lane.b32.xlu0 %v1780_v13, %s1710_s8 }
 0x151   :  { %v101_v14 = vpop.permute.xlu1 %100  ;;  %v97_v15 = vpop.permute.xlu0 %96 }
 0x155   :  { %v103_v16 = vpop.permute.xlu1 %102  ;;  %v99_v17 = vpop.permute.xlu0 %98 }
 0x156   :  { %v1783_v18 = vpack.i.bf16 %v103_v16, %v101_v14  ;;  %v1785_v19 = vpack.i.bf16 %v99_v17, %v97_v15 }
 0x158   :  { %1583 = vrot.lane.b32.xlu0 %v1783_v18, %s1710_s8  ;;  %1578 = vrot.lane.b32.xlu1 %v1785_v19, %s1710_s8 }
 0x159   :  { %v107_v20 = vpop.permute.xlu1 %106  ;;  %v105_v21 = vpop.permute.xlu0 %104 }
 0x15a   :  { %v1789_v22 = vpack.i.bf16 %v107_v20, %v105_v21  ;;  %1452 = vmatprep.mubr.msk.f32.mxu0 %vm112_vm2, %v105_v21 }
 0x15c   :  { %1588 = vrot.lane.b32.xlu1 %v1789_v22, %s1710_s8 }
 0x15d   :  { %v1574_v23 = vpop.permute.xlu0 %1573 }
 0x15e   :  { %v1576_v24 = vunpack.i.h.bf16 %v1574_v23  ;;  %v1575_v25 = vunpack.i.l.bf16 %v1574_v23 }
 0x160   :  { %v1519_v27 = vpack.c.bf16 %v1576_v24, %v1575_v25 }
 0x162   :  { %1521 = vmatprep.subr.msk.bf16.mxu1 %vm1795_vm3, %v1519_v27 }
 0x163   :  { %1524 = vmatpush3.bf16.xpose.msk.msra.mxu1 %vm1795_vm3, %v1519_v27 }
 0x16a   :  { %1432 = vmatmul.mubr.msk.f32.vlgmr.msra.gmra.mrb[4].mxu1 %vm112_vm2, %v91_v12 }
 0x16b   :  { %1438 = vmatprep.mubr.msk.f32.mxu1 %vm112_vm2, %v97_v15 }
 0x1ca   :  { %v1579_v28 = vpop.permute.xlu1 %1578  ;;  %v1584_v29 = vpop.permute.xlu0 %1583 }
 0x1cb   :  { %v1581_v30 = vunpack.i.h.bf16 %v1579_v28  ;;  %v1580_v31 = vunpack.i.l.bf16 %v1579_v28  ;;  %v1586_v32 = vunpack.i.h.bf16 %v1584_v29  ;;  %v1585_v33 = vunpack.i.l.bf16 %v1584_v29 }
 0x1cd   :  { %v1525_v34 = vpack.c.bf16 %v1581_v30, %v1580_v31  ;;  %v1531_v36 = vpack.c.bf16 %v1586_v32, %v1585_v33 }
 0x1ce   :  { %v1589_v35 = vpop.permute.xlu1 %1588 }
 0x1cf   :  { %v1591_v37 = vunpack.i.h.bf16 %v1589_v35  ;;  %v1590_v38 = vunpack.i.l.bf16 %v1589_v35  ;;  %1527 = vmatprep.subr.msk.bf16.mxu1 %vm1795_vm3, %v1525_v34 }
 0x1d0   :  { %1530 = vmatpush3.bf16.xpose.msk.msra.mxu1 %vm1795_vm3, %v1525_v34 }
 0x1d1   :  { %1533 = vmatprep.subr.msk.bf16.mxu1 %vm1795_vm3, %v1531_v36  ;;  %v1537_v39 = vpack.c.bf16 %v1591_v37, %v1590_v38 }
 0x1d3   :  { %1539 = vmatprep.subr.msk.bf16.mxu0 %vm1795_vm3, %v1537_v39 }
 0x1d4   :  { %1542 = vmatpush3.bf16.xpose.msk.msra.mxu0 %vm1795_vm3, %v1537_v39 }
 0x1d7   :  { %1439 = vmatmul.mubr.msk.f32.vlgmr.msra.gmra.mrb[6].mxu1 %vm112_vm2, %v99_v17 }
 0x1d8   :  { %1536 = vmatpush3.bf16.xpose.msk.msra.mxu1 %vm1795_vm3, %v1531_v36  ;;  %1445 = vmatprep.mubr.msk.f32.mxu1 %vm112_vm2, %v101_v14 }
 0x1db   :  { %1453 = vmatmul.mubr.msk.f32.vlgmr.msra.gmra.mrb[0].mxu0 %vm112_vm2, %v107_v20 }
 0x1df   :  { %1446 = vmatmul.mubr.msk.f32.vlgmr.msra.gmra.mrb[8].mxu1 %vm112_vm2, %v103_v16 }
 0x23d   :  { %v1433_v42 = vpop.f32.mrb[4].mxu1 }
 0x23e   :  { %v458_v45 = vmul.f32 0.35355338, %v1433_v42  ;;  %v187_v46 = vpop.f32.mrb[5].mxu1 }
 0x23f   :  { %v457_v48 = vmul.f32 0.35355338, %v187_v46 }
 0x240   :  { %v497_v49 = vadd.f32 %v495_v44, %v458_v45 }
 0x241   :  { %v496_v50 = vadd.f32 %v494_v47, %v457_v48 }
 0x242   :  { %v508_v51 = vsel %vm504_vm8, %v497_v49, -inf }
 0x243   :  { %509 = vmax.xlane.f32.xlu1 %v508_v51  ;;  %v505_v52 = vsel %vm504_vm8, %v496_v50, -inf }
 0x244   :  { %506 = vmax.xlane.f32.xlu0 %v505_v52 }
 0x2aa   :  { %v1440_v53 = vpop.f32.mrb[6].mxu1 }
 0x2ab   :  { %v460_v54 = vmul.f32 0.35355338, %v1440_v53  ;;  %v274_v55 = vpop.f32.mrb[7].mxu1 }
 0x2ac   :  { %v459_v56 = vmul.f32 0.35355338, %v274_v55 }
 0x2ad   :  { %v499_v57 = vadd.f32 %v495_v44, %v460_v54 }
 0x2ae   :  { %v1454_v58 = vpop.f32.mrb[0].mxu0  ;;  %v498_v61 = vadd.f32 %v494_v47, %v459_v56 }
 0x2af   :  { %v448_v59 = vpop.f32.mrb[1].mxu0  ;;  %v514_v60 = vsel %vm504_vm8, %v499_v57, -inf  ;;  %v464_v2 = vmul.f32 0.35355338, %v1454_v58 }
 0x2b0   :  { %v463_v62 = vmul.f32 0.35355338, %v448_v59  ;;  %515 = vmax.xlane.f32.xlu0 %v514_v60  ;;  %v511_v7 = vsel %vm504_vm8, %v498_v61, -inf }
 0x2b1   :  { %v503_v14 = vadd.f32 %v495_v44, %v464_v2 }
 0x2b2   :  { %v1447_v63 = vpop.f32.mrb[8].mxu1  ;;  %v502_v0 = vadd.f32 %v494_v47, %v463_v62 }
 0x2b3   :  { %v462_v5 = vmul.f32 0.35355338, %v1447_v63  ;;  %v361_v6 = vpop.f32.mrb[9].mxu1  ;;  %v526_v16 = vsel %vm504_vm8, %v503_v14, -inf }
 0x2b4   :  { %v461_v8 = vmul.f32 0.35355338, %v361_v6  ;;  %512 = vmax.xlane.f32.xlu0 %v511_v7  ;;  %v523_v9 = vsel %vm504_vm8, %v502_v0, -inf }
 0x2b5   :  { %524 = vmax.xlane.f32.xlu1 %v523_v9  ;;  %v501_v10 = vadd.f32 %v495_v44, %v462_v5 }
 0x2b6   :  { %v1826_v11 = vadd.f32 %v494_v47, %v461_v8 }
 0x2b7   :  { %v520_v12 = vsel %vm504_vm8, %v501_v10, -inf }
 0x2b8   :  { %521 = vmax.xlane.f32.xlu0 %v520_v12  ;;  %v517_v15 = vsel %vm504_vm8, %v1826_v11, -inf }
 0x2b9   :  { %518 = vmax.xlane.f32.xlu1 %v517_v15 }
 0x2bc   :  { %527 = vmax.xlane.f32.xlu0 %v526_v16 }
 0x2ca   :  { %1593 = vrot.lane.b32.xlu1 %v1780_v13, %s1712_s9 }
 0x2d0   :  { %v510_v17 = vpop.xlane.xlu1 %509 }
 0x2d1   :  { %v530_v20 = vsub.f32 %v497_v49, %v510_v17  ;;  %v507_v23 = vpop.xlane.xlu0 %506 }
 0x2d2   :  { %v529_v24 = vsub.f32 %v496_v50, %v507_v23 }
 0x2d3   :  { %v539_v21 = vmul.f32 1.442695, %v530_v20 }
 0x2d4   :  { %v537_v25 = vmul.f32 1.442695, %v529_v24 }
 0x2d5   :  { %1641 = vpow2.f32 %v539_v21 }
 0x2d6   :  { %1643 = vpow2.f32 %v537_v25 }
 0x2df   :  { %v1642_v26 = vpop.eup %1641 }
 0x2e0   :  { %v556_v27 = vsel %vm504_vm8, %v1642_v26, 0.0  ;;  %v1644_v28 = vpop.eup %1643 }
 0x2e1   :  { %557 = vadd.xlane.f32.xlu0 %v556_v27  ;;  %v553_v29 = vsel %vm504_vm8, %v1644_v28, 0.0 }
 0x2ee   :  { %554 = vadd.xlane.f32.xlu1 %v553_v29 }
 0x33d   :  { %v516_v30 = vpop.xlane.xlu0 %515 }
 0x33e   :  { %v532_v31 = vsub.f32 %v499_v57, %v516_v30 }
 0x340   :  { %v543_v32 = vmul.f32 1.442695, %v532_v31 }
 0x341   :  { %v513_v13 = vpop.xlane.xlu0 %512 }
 0x342   :  { %1645 = vpow2.f32 %v543_v32  ;;  %v531_v33 = vsub.f32 %v498_v61, %v513_v13  ;;  %v525_v34 = vpop.xlane.xlu1 %524 }
 0x343   :  { %v535_v35 = vsub.f32 %v502_v0, %v525_v34 }
 0x344   :  { %v541_v36 = vmul.f32 1.442695, %v531_v33 }
 0x345   :  { %v549_v37 = vmul.f32 1.442695, %v535_v35  ;;  %v522_v38 = vpop.xlane.xlu0 %521 }
 0x346   :  { %1647 = vpow2.f32 %v541_v36  ;;  %v519_v39 = vpop.xlane.xlu1 %518  ;;  %v534_v40 = vsub.f32 %v501_v10, %v522_v38 }
 0x347   :  { %1649 = vpow2.f32 %v549_v37  ;;  %v533_v59 = vsub.f32 %v1826_v11, %v519_v39 }
 0x348   :  { %v547_v47 = vmul.f32 1.442695, %v534_v40 }
 0x349   :  { %v528_v41 = vpop.xlane.xlu0 %527  ;;  %v545_v61 = vmul.f32 1.442695, %v533_v59 }
 0x34a   :  { %v536_v42 = vsub.f32 %v503_v14, %v528_v41  ;;  %v1594_v43 = vpop.permute.xlu1 %1593 }
 0x34b   :  { %v1596_v44 = vunpack.i.h.bf16 %v1594_v43  ;;  %v1595_v45 = vunpack.i.l.bf16 %v1594_v43  ;;  %v1629_v43 = vld [vmem:[%s1978_s2] sm:$0xff]  }
 0x34c   :  { %v1836_v46 = vpop.eup %1645  ;;  %v551_v48 = vmul.f32 1.442695, %v536_v42 }
 0x34d   :  { %v1543_v49 = vpack.c.bf16 %v1596_v44, %v1595_v45  ;;  %v562_v50 = vsel %vm504_vm8, %v1836_v46, 0.0  ;;  %v1630_v44 = vld [vmem:[%s1978_s2 + $0x8] sm:$0xff]  }
 0x34e   :  { %1651 = vpow2.f32 %v551_v48  ;;  %563 = vadd.xlane.f32.xlu0 %v562_v50 }
 0x34f   :  { %1544 = vmatprep.subr.bf16.mxu1 %v1543_v49  ;;  %1653 = vpow2.f32 %v547_v47 }
 0x350   :  { %v1648_v51 = vpop.eup %1647  ;;  %1546 = vmatpush3.bf16.msra.mxu1 %v1543_v49 }
 0x351   :  { %v559_v52 = vsel %vm504_vm8, %v1648_v51, 0.0  ;;  %v1650_v53 = vpop.eup %1649 }
 0x352   :  { %560 = vadd.xlane.f32.xlu1 %v559_v52  ;;  %v571_v54 = vsel %vm504_vm8, %v1650_v53, 0.0 }
 0x356   :  { %572 = vadd.xlane.f32.xlu1 %v571_v54 }
 0x358   :  { %v1842_v55 = vpop.eup %1651 }
 0x359   :  { %v574_v56 = vsel %vm504_vm8, %v1842_v55, 0.0  ;;  %v1846_v57 = vpop.eup %1653 }
 0x35a   :  { %575 = vadd.xlane.f32.xlu0 %v574_v56  ;;  %v568_v58 = vsel %vm504_vm8, %v1846_v57, 0.0 }
 0x35e   :  { %569 = vadd.xlane.f32.xlu0 %v568_v58 }
 0x367   :  { %1603 = vrot.lane.b32.xlu1 %v1783_v18, %s1712_s9 }
 0x36e   :  { %v558_v60 = vpop.xlane.xlu0 %557 }
 0x36f   :  { %1655 = vrcp.f32 %v558_v60 }
 0x374   :  { %1598 = vrot.lane.b32.xlu0 %v1785_v19, %s1712_s9 }
 0x379   :  { %v1656_v63 = vpop.eup %1655 }
 0x37a   :  { %v586_v6 = vmul.f32 %v1656_v63, %v1642_v26 }
 0x37b   :  { %v555_v62 = vpop.xlane.xlu1 %554 }
 0x37c   :  { %1657 = vrcp.f32 %v555_v62 }
 0x37d   :  { %1659 = vpow2.f32 %v545_v61 }
 0x386   :  { %v1658_v0 = vpop.eup %1657 }
 0x387   :  { %v1660_v2 = vpop.eup %1659  ;;  %v585_v5 = vmul.f32 %v1658_v0, %v1644_v28 }
 0x388   :  { %v565_v18 = vsel %vm504_vm8, %v1660_v2, 0.0 }
 0x389   :  { %1459 = vmatprep.mubr.msk.f32.mxu1 %vm504_vm8, %v585_v5 }
 0x38a   :  { %1460 = vmatmul.mubr.msk.f32.vlgmr.msra.gmra.mrb[10].mxu1 %vm504_vm8, %v586_v6  ;;  %v1348_v6 = vld [vmem:[%s1981_s5 + $0x1] ss:$0 sm:$0xff] }
 0x38b   :  { %566 = vadd.xlane.f32.xlu1 %v565_v18 }
 0x39c   :  { %1608 = vrot.lane.b32.xlu1 %v1789_v22, %s1712_s9 }
 0x3db   :  { %v564_v7 = vpop.xlane.xlu0 %563 }
 0x3df   :  { %v561_v19 = vpop.xlane.xlu1 %560 }
 0x3e0   :  { %1661 = vrcp.f32 %v561_v19 }
 0x3e1   :  { %1663 = vrcp.f32 %v564_v7 }
 0x3e3   :  { %v573_v8 = vpop.xlane.xlu1 %572 }
 0x3e4   :  { %1665 = vrcp.f32 %v573_v8 }
 0x3e7   :  { %v576_v9 = vpop.xlane.xlu0 %575  ;;  %v1604_v10 = vpop.permute.xlu1 %1603 }
 0x3e8   :  { %v1606_v11 = vunpack.i.h.bf16 %v1604_v10  ;;  %v1605_v12 = vunpack.i.l.bf16 %v1604_v10  ;;  %1667 = vrcp.f32 %v576_v9 }
 0x3ea   :  { %v1662_v14 = vpop.eup %1661  ;;  %v1551_v15 = vpack.c.bf16 %v1606_v11, %v1605_v12 }
 0x3eb   :  { %v570_v16 = vpop.xlane.xlu0 %569  ;;  %v587_v17 = vmul.f32 %v1662_v14, %v1648_v51  ;;  %v1664_v24 = vpop.eup %1663 }
 0x3ec   :  { %1552 = vmatprep.subr.bf16.mxu0 %v1551_v15  ;;  %v588_v26 = vmul.f32 %v1664_v24, %v1836_v46  ;;  %1669 = vrcp.f32 %v570_v16 }
 0x3ed   :  { %1466 = vmatprep.mubr.msk.f32.mxu1 %vm504_vm8, %v587_v17  ;;  %1554 = vmatpush3.bf16.msra.mxu0 %v1551_v15 }
 0x3ee   :  { %1483 = vmatprep.subr.bf16.mxu0 %v1705_v1  ;;  %v1666_v25 = vpop.eup %1665 }
 0x3ef   :  { %v1599_v22 = vpop.permute.xlu0 %1598  ;;  %v591_v27 = vmul.f32 %v1666_v25, %v1650_v53 }
 0x3f0   :  { %v1601_v20 = vunpack.i.h.bf16 %v1599_v22  ;;  %v1600_v21 = vunpack.i.l.bf16 %v1599_v22 }
 0x3f2   :  { %v1547_v23 = vpack.c.bf16 %v1601_v20, %v1600_v21  ;;  %v1668_v13 = vpop.eup %1667 }
 0x3f3   :  { %v592_v35 = vmul.f32 %v1668_v13, %v1842_v55  ;;  %v1638_v13 = vld [vmem:[%s1980_s4 + $0x28] sm:$0xff]  }
 0x3f4   :  { %1548 = vmatprep.subr.bf16.mxu1 %v1547_v23 }
 0x3f5   :  { %1550 = vmatpush3.bf16.msra.mxu1 %v1547_v23 }
 0x3f6   :  { %v1670_v33 = vpop.eup %1669 }
 0x3f7   :  { %v590_v37 = vmul.f32 %v1670_v33, %v1846_v57 }
 0x3f8   :  { %1467 = vmatmul.mubr.msk.f32.vlgmr.msra.gmra.mrb[12].mxu1 %vm504_vm8, %v588_v26 }
 0x3f9   :  { %1480 = vmatprep.mubr.msk.f32.mxu1 %vm504_vm8, %v591_v27  ;;  %v1632_v27 = vld [vmem:[%s1979_s3 + $0x8] sm:$0xff]  }
 0x418   :  { %v567_v28 = vpop.xlane.xlu1 %566 }
 0x419   :  { %1671 = vrcp.f32 %v567_v28  ;;  %v1633_v28 = vld [vmem:[%s1980_s4] sm:$0xff]  }
 0x41c   :  { %v1609_v29 = vpop.permute.xlu1 %1608 }
 0x41d   :  { %v1611_v30 = vunpack.i.h.bf16 %v1609_v29  ;;  %v1610_v31 = vunpack.i.l.bf16 %v1609_v29  ;;  %v1634_v29 = vld [vmem:[%s1980_s4 + $0x8] sm:$0xff]  }
 0x41f   :  { %v1555_v32 = vpack.c.bf16 %v1611_v30, %v1610_v31  ;;  %v1635_v30 = vld [vmem:[%s1980_s4 + $0x10] sm:$0xff]   ;;  %v1636_v31 = vld [vmem:[%s1980_s4 + $0x18] sm:$0xff]  }
 0x421   :  { %1556 = vmatprep.subr.bf16.mxu1 %v1555_v32 }
 0x422   :  { %1558 = vmatpush3.bf16.msra.mxu1 %v1555_v32  ;;  %v1637_v32 = vld [vmem:[%s1980_s4 + $0x20] sm:$0xff]  }
 0x423   :  { %v1672_v34 = vpop.eup %1671  ;;  %1491 = vmatprep.subr.bf16.mxu1 %v1705_v1 }
 0x424   :  { %v589_v36 = vmul.f32 %v1672_v34, %v1660_v2 }
 0x425   :  { %1481 = vmatmul.mubr.msk.f32.vlgmr.msra.gmra.mrb[14].mxu1 %vm504_vm8, %v592_v35 }
 0x426   :  { %1473 = vmatprep.mubr.msk.f32.mxu0 %vm504_vm8, %v589_v36  ;;  %1495 = vmatprep.mubr.msk.bf16.mxu1 %vm1706_vm0, %v1705_v1 }
 0x427   :  { %1474 = vmatmul.mubr.msk.f32.vlgmr.msra.gmra.mrb[2].mxu0 %vm504_vm8, %v590_v37 }
 0x428   :  { %1487 = vmatprep.mubr.msk.bf16.mxu0 %vm1706_vm0, %v1705_v1  ;;  %1484 = vmatpush3.bf16.msra.mxu0 %v1629_v43 }
 0x429   :  { %1485 = vmatprep.subr.bf16.mxu0 %v1705_v1 }
 0x42c   :  { %1486 = vmatpush3.bf16.msra.mxu0 %v1630_v44 }
 0x42d   :  { %1499 = vmatprep.subr.bf16.mxu0 %v1705_v1 }
 0x45d   :  { %v1461_v38 = vpop.f32.mrb[10].mxu1 }
 0x45e   :  { %v671_v39 = vpop.f32.mrb[11].mxu1 }
 0x4cb   :  { %v1468_v40 = vpop.f32.mrb[12].mxu1 }
 0x4cc   :  { %v758_v41 = vpop.f32.mrb[13].mxu1 }
 0x4cd   :  { %v1612_v42 = vpack.i.bf16 %v1468_v40, %v758_v41  ;;  %v1352_v40 = vld [vmem:[%s1981_s5 + $0x4] ss:$0 sm:$0xff] }
 0x4cf   :  { %1613 = vrot.lane.b32.xlu0 %v1612_v42, %s1713_s10 }
 0x4f8   :  { %v1482_v45 = vpop.f32.mrb[14].mxu1 }
 0x4f9   :  { %v932_v46 = vpop.f32.mrb[15].mxu1 }
 0x4fa   :  { %v1622_v47 = vpack.i.bf16 %v1482_v45, %v932_v46  ;;  %v1475_v48 = vpop.f32.mrb[2].mxu0  ;;  %v1353_v45 = vld [vmem:[%s1981_s5 + $0x5] ss:$0 sm:$0xff] }
 0x4fb   :  { %v845_v49 = vpop.f32.mrb[3].mxu0 }
 0x4fc   :  { %v1617_v50 = vpack.i.bf16 %v1475_v48, %v845_v49  ;;  %1623 = vrot.lane.b32.xlu0 %v1622_v47, %s1714_s15 }
 0x4fe   :  { %1618 = vrot.lane.b32.xlu1 %v1617_v50, %s1715_s16  ;;  %v1639_v50 = vld [vmem:[%s1980_s4 + $0x30] sm:$0xff]  }
 0x541   :  { %v1614_v51 = vpop.permute.xlu0 %1613 }
 0x542   :  { %v1616_v52 = vunpack.i.h.bf16 %v1614_v51  ;;  %v1615_v53 = vunpack.i.l.bf16 %v1614_v51  ;;  %v1640_v51 = vld [vmem:[%s1980_s4 + $0x38] sm:$0xff]  }
 0x544   :  { %v966_v58 = vsel %vm112_vm2, %v1461_v38, %v1616_v52  ;;  %v965_v59 = vsel %vm112_vm2, %v671_v39, %v1615_v53  ;;  %v1354_v52 = vld [vmem:[%s1981_s5 + $0x2] ss:$0 sm:$0xff] }
 0x56e   :  { %v1624_v54 = vpop.permute.xlu0 %1623 }
 0x56f   :  { %v1626_v60 = vunpack.i.h.bf16 %v1624_v54  ;;  %v1625_v61 = vunpack.i.l.bf16 %v1624_v54 }
 0x570   :  { %v1619_v55 = vpop.permute.xlu1 %1618 }
 0x571   :  { %v1621_v56 = vunpack.i.h.bf16 %v1619_v55  ;;  %v1620_v57 = vunpack.i.l.bf16 %v1619_v55 }
 0x573   :  { %v967_v62 = vsel %vm504_vm8, %v965_v59, %v1620_v57  ;;  %v968_v63 = vsel %vm504_vm8, %v966_v58, %v1621_v56 }
 0x574   :  { %v970_v0 = vsel %vm969_vm9, %v967_v62, %v1625_v61  ;;  %v971_v2 = vsel %vm969_vm9, %v968_v63, %v1626_v60 }
 0x575   :  { %v972_v5 = vpack.c.bf16 %v971_v2, %v970_v0 }
 0x577   :  { %1488 = vmatmul.mubr.msk.bf16.vlgmr.msra.gmra.mrb[4].mxu0 %vm49_vm1, %v972_v5 }
 0x578   :  { %1515 = vmatprep.mubr.msk.bf16.mxu0 %vm1706_vm0, %v1705_v1  ;;  %1500 = vmatpush3.bf16.msra.mxu0 %v1633_v28 }
 0x579   :  { %1501 = vmatprep.subr.bf16.mxu0 %v1705_v1 }
 0x57c   :  { %1502 = vmatpush3.bf16.msra.mxu0 %v1634_v29 }
 0x57d   :  { %1503 = vmatprep.subr.bf16.mxu0 %v1705_v1 }
 0x580   :  { %1504 = vmatpush3.bf16.msra.mxu0 %v1635_v30  ;;  %v1368_v30 = vld [vmem:[%s1981_s5 + $0x7] ss:$0 sm:$0xff] }
 0x581   :  { %1505 = vmatprep.subr.bf16.mxu0 %v1705_v1 }
 0x584   :  { %1506 = vmatpush3.bf16.msra.mxu0 %v1636_v31 }
 0x585   :  { %1507 = vmatprep.subr.bf16.mxu0 %v1705_v1 }
 0x588   :  { %1508 = vmatpush3.bf16.msra.mxu0 %v1637_v32 }
 0x589   :  { %1509 = vmatprep.subr.bf16.mxu0 %v1705_v1 }
 0x58c   :  { %1510 = vmatpush3.bf16.msra.mxu0 %v1638_v13 }
 0x58d   :  { %1511 = vmatprep.subr.bf16.mxu0 %v1705_v1 }
 0x590   :  { %1512 = vmatpush3.bf16.msra.mxu0 %v1639_v50 }
 0x591   :  { %1513 = vmatprep.subr.bf16.mxu0 %v1705_v1 }
 0x594   :  { %1514 = vmatpush3.bf16.msra.mxu0 %v1640_v51 }
 0x64a   :  { %v1031_v18 = vpop.f32.mrb[4].mxu0 }
 0x64b   :  { %v1032_v19 = vadd.f32 %v1348_v6, %v1031_v18  ;;  %v1489_v7 = vpop.f32.mrb[5].mxu0 }
 0x64c   :  { %v1034_v8 = vpop.f32.mrb[6].mxu0 }
 0x64d   :  { %v1035_v9 = vadd.f32 %v1348_v6, %v1034_v8  ;;  %v1490_v10 = vpop.f32.mrb[7].mxu0  ;;  %v1038_v11 = vadd.f32 %v1032_v19, %v1765_v3 }
 0x64f   :  { %v1040_v12 = vsel %vm49_vm1, %v1038_v11, 0.0  ;;  %v1039_v14 = vadd.f32 %v1035_v9, %v1770_v4  ;;  %v1631_v4 = vld [vmem:[%s1979_s3] sm:$0xff]  }
 0x650   :  { %1041 = vadd.xlane.f32.xlu1 %v1040_v12  ;;  %1492 = vmatpush3.bf16.msra.mxu1 %v1631_v4 }
 0x651   :  { %v1043_v15 = vsel %vm49_vm1, %v1039_v14, 0.0  ;;  %1493 = vmatprep.subr.bf16.mxu1 %v1705_v1  ;;  %v1358_v1 = vld [vmem:[%s1981_s5 + $0x3] ss:$0 sm:$0xff] }
 0x652   :  { %1044 = vadd.xlane.f32.xlu0 %v1043_v15 }
 0x654   :  { %1494 = vmatpush3.bf16.msra.mxu1 %v1632_v27  ;;  %v1367_v27 = vld [vmem:[%s1981_s5 + $0x6] ss:$0 sm:$0xff] }
 0x6dd   :  { %v1042_v16 = vpop.xlane.xlu1 %1041 }
 0x6de   :  { %v1047_v17 = vmul.f32 0.03125, %v1042_v16 }
 0x6df   :  { %v1045_v22 = vpop.xlane.xlu0 %1044 }
 0x6e0   :  { %v1049_v20 = vsub.f32 %v1038_v11, %v1047_v17  ;;  %v1048_v21 = vmul.f32 0.03125, %v1045_v22 }
 0x6e2   :  { %v1050_v23 = vsub.f32 %v1039_v14, %v1048_v21  ;;  %v1051_v24 = vmul.f32 %v1049_v20, %v1049_v20 }
 0x6e4   :  { %v1053_v25 = vsel %vm49_vm1, %v1051_v24, 0.0  ;;  %v1052_v26 = vmul.f32 %v1050_v23, %v1050_v23 }
 0x6e5   :  { %1054 = vadd.xlane.f32.xlu0 %v1053_v25 }
 0x6e6   :  { %v1056_v3 = vsel %vm49_vm1, %v1052_v26, 0.0 }
 0x6e7   :  { %1057 = vadd.xlane.f32.xlu1 %v1056_v3 }
 0x772   :  { %v1055_v33 = vpop.xlane.xlu0 %1054 }
 0x773   :  { %v1059_v34 = vmul.f32 0.03125, %v1055_v33 }
 0x774   :  { %v1058_v35 = vpop.xlane.xlu1 %1057 }
 0x775   :  { %v1061_v36 = vadd.f32 1e-05, %v1059_v34  ;;  %v1060_v37 = vmul.f32 0.03125, %v1058_v35 }
 0x777   :  { %1673 = vrsqrt.f32 %v1061_v36  ;;  %v1062_v38 = vadd.f32 1e-05, %v1060_v37 }
 0x779   :  { %1675 = vrsqrt.f32 %v1062_v38 }
 0x781   :  { %v1674_v39 = vpop.eup %1673 }
 0x782   :  { %v1065_v41 = vmul.f32 %v1674_v39, %v1049_v20 }
 0x783   :  { %v1676_v42 = vpop.eup %1675 }
 0x784   :  { %v1072_v43 = vmul.f32 %v1352_v40, %v1065_v41  ;;  %v1066_v44 = vmul.f32 %v1676_v42, %v1050_v23 }
 0x786   :  { %v1073_v46 = vmul.f32 %v1352_v40, %v1066_v44  ;;  %v1079_v47 = vadd.f32 %v1353_v45, %v1072_v43 }
 0x788   :  { %v1080_v48 = vadd.f32 %v1353_v45, %v1073_v46 }
 0x78a   :  { %v1081_v49 = vpack.c.bf16 %v1080_v48, %v1079_v47 }
 0x78c   :  { %1496 = vmatmul.mubr.msk.bf16.vlgmr.msra.gmra.mrb[16].mxu1 %vm49_vm1, %v1081_v49 }
 0x85f   :  { %v1140_v53 = vpop.f32.mrb[16].mxu1 }
 0x860   :  { %v1141_v54 = vadd.f32 %v1354_v52, %v1140_v53  ;;  %v1497_v55 = vpop.f32.mrb[17].mxu1 }
 0x861   :  { %v1143_v56 = vpop.f32.mrb[18].mxu1 }
 0x862   :  { %v1144_v57 = vadd.f32 %v1354_v52, %v1143_v56  ;;  %v1498_v58 = vpop.f32.mrb[19].mxu1  ;;  %v1147_v59 = vmax.f32 %v1141_v54, 0.0 }
 0x864   :  { %v1148_v60 = vmax.f32 %v1144_v57, 0.0 }
 0x866   :  { %v1149_v61 = vpack.c.bf16 %v1148_v60, %v1147_v59 }
 0x868   :  { %1516 = vmatmul.mubr.bf16.vlgmr.msra.gmra.mrb[8].mxu0 %v1149_v61 }
 0x93b   :  { %v1253_v62 = vpop.f32.mrb[8].mxu0 }
 0x93c   :  { %v1254_v63 = vadd.f32 %v1358_v1, %v1253_v62  ;;  %v1517_v0 = vpop.f32.mrb[9].mxu0 }
 0x93d   :  { %v1256_v2 = vpop.f32.mrb[10].mxu0 }
 0x93e   :  { %v1257_v5 = vadd.f32 %v1358_v1, %v1256_v2  ;;  %v1518_v6 = vpop.f32.mrb[11].mxu0  ;;  %v1260_v18 = vadd.f32 %v1254_v63, %v1079_v47 }
 0x940   :  { %v1262_v19 = vsel %vm49_vm1, %v1260_v18, 0.0  ;;  %v1261_v7 = vadd.f32 %v1257_v5, %v1080_v48 }
 0x941   :  { %1263 = vadd.xlane.f32.xlu0 %v1262_v19 }
 0x942   :  { %v1265_v8 = vsel %vm49_vm1, %v1261_v7, 0.0 }
 0x943   :  { %1266 = vadd.xlane.f32.xlu1 %v1265_v8 }
 0x9ce   :  { %v1264_v9 = vpop.xlane.xlu0 %1263 }
 0x9cf   :  { %v1268_v10 = vmul.f32 0.03125, %v1264_v9 }
 0x9d0   :  { %v1267_v11 = vpop.xlane.xlu1 %1266 }
 0x9d1   :  { %v1270_v12 = vsub.f32 %v1260_v18, %v1268_v10  ;;  %v1269_v14 = vmul.f32 0.03125, %v1267_v11 }
 0x9d3   :  { %v1271_v15 = vsub.f32 %v1261_v7, %v1269_v14  ;;  %v1272_v16 = vmul.f32 %v1270_v12, %v1270_v12 }
 0x9d5   :  { %v1274_v17 = vsel %vm49_vm1, %v1272_v16, 0.0  ;;  %v1273_v22 = vmul.f32 %v1271_v15, %v1271_v15 }
 0x9d6   :  { %1275 = vadd.xlane.f32.xlu0 %v1274_v17 }
 0x9d7   :  { %v1277_v20 = vsel %vm49_vm1, %v1273_v22, 0.0 }
 0x9d8   :  { %1278 = vadd.xlane.f32.xlu1 %v1277_v20 }
 0xa63   :  { %v1276_v21 = vpop.xlane.xlu0 %1275 }
 0xa64   :  { %v1280_v23 = vmul.f32 0.03125, %v1276_v21 }
 0xa65   :  { %v1279_v24 = vpop.xlane.xlu1 %1278 }
 0xa66   :  { %v1282_v25 = vadd.f32 1e-05, %v1280_v23  ;;  %v1281_v26 = vmul.f32 0.03125, %v1279_v24 }
 0xa68   :  { %1677 = vrsqrt.f32 %v1282_v25  ;;  %v1283_v3 = vadd.f32 1e-05, %v1281_v26 }
 0xa6a   :  { %1679 = vrsqrt.f32 %v1283_v3 }
 0xa72   :  { %v1678_v4 = vpop.eup %1677 }
 0xa73   :  { %v1286_v28 = vmul.f32 %v1678_v4, %v1270_v12 }
 0xa74   :  { %v1680_v29 = vpop.eup %1679 }
 0xa75   :  { %v1287_v31 = vmul.f32 %v1680_v29, %v1271_v15  ;;  %v1293_v32 = vmul.f32 %v1367_v27, %v1286_v28 }
 0xa77   :  { %v1294_v13 = vmul.f32 %v1367_v27, %v1287_v31  ;;  %v1300_v33 = vadd.f32 %v1368_v30, %v1293_v32 }
 0xa79   :  { %v1301_v34 = vadd.f32 %v1368_v30, %v1294_v13  ;;  %1302 = vst.msk [vmem:[#allocation2] sm:$0xff] %vm49_vm1, %v1300_v33 }
 0xa7b   :  { %1303 = vst.msk [vmem:[#allocation2 + $0x8] sm:$0xff] %vm49_vm1, %v1301_v34 }
 0xa7c   :  { %1692 = shalt.err (!%p1689_p4)
}
 0xa7d   :  { %s1693_s26 = scalar_lea.hbm %s1982_s6, 256 }
 0xa7e   :  { %p1694_p5 = scmp.ne.s32.totalorder %s1982_s6, %s1693_s26  ;;  %p1697_p6 = scmp.lt.u32.totalorder %s1693_s26, %s1982_s6 }
 0xa80   :  { %p1699_p7 = pnand %p1697_p6, %p1694_p5 }
 0xa82   :  { %1702 = shalt.err (!%p1699_p7)
}
 0xa83   :  { %s1717_s29 = smov 128  }
 0xa84   :  { %1315 = dma.vmem_to_hbm [thread:$0]  %s1310_s23, 256, %s1982_s6, [#allocation3], %s1717_s29, %s1717_s29, %s1713_s10  }
 0xa85   :  { %1703 = dma.done.wait [#allocation3], 256  }
 0xa86   :  { %1704 = vsyncadd [#allocation3], 4294967040 }
 0xa87   :  { %1319 = vsyncpa [#allocation3], 1 }

</bundles_post_ra>
